<compile_context>
chip_gen: v7x
topology: tpu7x:2x2x1
jax: 0.10.0
libtpu: 0.0.40
codegen_flags: <defaults>
</compile_context>

<pallas_src>
import functools

import jax
import jax.numpy as jnp
from jax.experimental import pallas as pl
from jax.experimental.pallas import tpu as pltpu


def _ceil_to(n, m):
    return -(-int(n) // m) * m


# ---------------------------------------------------------------------------
# Pass A: per-component sums (for the global mean).  Parallel over tiles.
# ---------------------------------------------------------------------------
def _component_sum_kernel(x_ref, part_ref):
    x = x_ref[...].astype(jnp.float32)            # (2, B*F, tS), dense sublanes
    two, rows, ts = x.shape
    xs = x.reshape(two, rows, ts // 128, 128)     # lane split only (layout-free)
    part_ref[0] = jnp.sum(xs, axis=(1, 2))        # (2, 128) per-lane partials


# ---------------------------------------------------------------------------
# Pass B: per-channel magnitude statistics.  Parallel over tiles.
# ---------------------------------------------------------------------------
def _mag_stats_kernel(mean_ref, x_ref, part_ref, *, mmax):
    mr = mean_ref[0]
    mi = mean_ref[1]
    # Ref-level slice: only channels [0:mmax) are ever used by the reference.
    xc = x_ref[:, :, 0:mmax, :]                   # (2, B, mmax, tS)
    cr = xc[0].astype(jnp.float32) - mr
    ci = xc[1].astype(jnp.float32) - mi
    sq = cr * cr + ci * ci                        # |z|^2 (needed for sqrt anyway)
    mag = jnp.sqrt(sq)
    b, c, ts = sq.shape
    l = ts // 128
    # Per-channel, per-lane partial sums (VPU adds only; lanes reduced in the
    # wrapper) — no per-group redundant reductions, better accumulation accuracy.
    part_ref[0, 0] = jnp.sum(mag.reshape(b, c, l, 128), axis=(0, 2))   # (mmax,128)
    part_ref[0, 1] = jnp.sum(sq.reshape(b, c, l, 128), axis=(0, 2))


# ---------------------------------------------------------------------------
# Pass C: center + scale.  Parallel over tiles.
# ---------------------------------------------------------------------------
def _normalize_kernel(mean_ref, inv_ref, x_ref, o_ref, *, repr_tuple, uniq_index,
                      mmax):
    mr = mean_ref[0]
    mi = mean_ref[1]
    # Center once; every group reuses the same slab (reference never advances
    # `prev`, so each group reads channels [0:mult)).
    xc = x_ref[:, :, 0:mmax, :]                   # (2, B, mmax, tS)
    cr = xc[0].astype(jnp.float32) - mr
    ci = xc[1].astype(jnp.float32) - mi

    cache = {}                                    # duplicate widths share the slab
    off = 0
    for mult in repr_tuple:
        if mult not in cache:
            s = inv_ref[uniq_index[mult]]         # scalar 1/(std+eps)
            cache[mult] = ((cr[:, 0:mult, :] * s).astype(o_ref.dtype),
                           (ci[:, 0:mult, :] * s).astype(o_ref.dtype))
        pr, pi = cache[mult]
        # Direct per-group stores at static channel offsets (no concatenate).
        o_ref[0, :, off:off + mult, :] = pr
        o_ref[1, :, off:off + mult, :] = pi
        off += mult


# ---------------------------------------------------------------------------
# Wrapper helpers.
# ---------------------------------------------------------------------------
def _vmem_capacity_bytes():
    try:
        cap = int(pltpu.get_tpu_info().vmem_capacity_bytes)
        if cap > 0:
            return cap
    except Exception:
        pass
    return 64 * 1024 * 1024        # conservative (v7x-sized) fallback


def _choose_spatial_tiling(S, row_bytes_f32, vmem_cap):
    """Returns (tS, S_pad): tS % 128 == 0, S_pad % tS == 0, S_pad >= S."""
    # Generation-aware working-block target (bigger tiles amortize the ~0.35us
    # per-grid-step overhead; v7x's 64 MiB VMEM gets the smaller target).
    target = (6 << 20) if vmem_cap >= (96 << 20) else (4 << 20)
    max_ts = max(128, (target // max(int(row_bytes_f32), 1)) // 128 * 128)
    if S % 128 == 0:
        divs = [d for d in range(128, min(S, max_ts) + 1, 128) if S % d == 0]
        if divs:
            # Prefer >= 2 tiles so the "parallel" grid can feed both v7x cores.
            multi = [d for d in divs if S // d >= 2]
            return (max(multi) if multi else max(divs)), S
    # Awkward spatial extent: pad up to a multiple of 128 (contribution of the
    # zero padding is corrected analytically in the finalize).
    s128 = _ceil_to(S, 128)
    if s128 <= max_ts:
        return s128, s128
    n_tiles = -(-s128 // max_ts)
    return max_ts, n_tiles * max_ts


def group_norm_2d(x, repr_tuple, eps=1e-3):
    """x: (2, B, F, W, H) float array. Returns an array of the same shape."""
    repr_tuple = tuple(int(m) for m in repr_tuple)
    n_features = sum(repr_tuple)
    if x.shape[2] != n_features:
        raise ValueError(
            "1st dimension on input `x` ({}) doesn't match with declared # of "
            "features ({} == sum({}))".format(x.shape[2], n_features, repr_tuple))

    two, B, F, W, H = x.shape
    assert two == 2, "leading axis must hold the (real, imag) pair"
    S = W * H
    mmax = max(repr_tuple)
    uniq_mults = tuple(sorted(set(repr_tuple)))
    uniq_index = {m: k for k, m in enumerate(uniq_mults)}

    # Channels actually DMA'd in passes B/C: trim to ceil8(mmax) when that is a
    # legal block extent (< F and multiple of 8), otherwise the full extent F.
    c_in = F if _ceil_to(mmax, 8) >= F else _ceil_to(mmax, 8)

    vmem_cap = _vmem_capacity_bytes()
    row_f32 = 8 * B * _ceil_to(F, 8)          # f32 bytes per spatial element (one slab)
    tS, S_pad = _choose_spatial_tiling(S, row_f32, vmem_cap)
    nS = S_pad // tS

    xr = x.reshape(2, B, F, S)
    if S_pad > S:
        xr = jnp.pad(xr, ((0, 0), (0, 0), (0, 0), (0, S_pad - S)))
    xa = xr.reshape(2, B * F, S_pad)          # dense sublane view for pass A

    # VMEM budget from the actual (sublane-padded) blocks, double-buffered, plus
    # f32 temporaries; capped at physical VMEM minus headroom (v7x-safe).
    itemsize = jnp.dtype(x.dtype).itemsize
    blk_a = 2 * _ceil_to(B * F, 8) * tS * itemsize
    blk_in = 2 * B * _ceil_to(c_in, 8) * tS * itemsize
    blk_out = 2 * B * _ceil_to(F, 8) * tS * itemsize
    slab_f32 = 2 * B * _ceil_to(mmax, 8) * tS * 4
    need = 2 * (blk_a + blk_in + blk_out) + 3 * slab_f32 + (4 << 20)
    hi = max(32 << 20, int(vmem_cap) - (12 << 20))
    vmem_limit = int(min(hi, max(32 << 20, need)))

    cparams = pltpu.CompilerParams(dimension_semantics=("parallel",),
                                   vmem_limit_bytes=vmem_limit)

    # ---- Pass A: per-component sums (per-tile partials, reduced in the wrapper).
    parts_a = pl.pallas_call(
        _component_sum_kernel,
        out_shape=jax.ShapeDtypeStruct((nS, 2, 128), jnp.float32),
        grid_spec=pltpu.PrefetchScalarGridSpec(
            num_scalar_prefetch=0,
            grid=(nS,),
            in_specs=[pl.BlockSpec((2, B * F, tS), lambda i: (0, 0, i))],
            out_specs=pl.BlockSpec((1, 2, 128), lambda i: (i, 0, 0)),
        ),
        compiler_params=cparams,
    )(xa)

    n_x = float(B * F * S)                       # zero padding adds nothing to sums
    means = (parts_a.sum(axis=(0, 2)) / jnp.float32(n_x)).astype(jnp.float32)  # (2,)

    # ---- Pass B: per-channel magnitude statistics.
    parts_b = pl.pallas_call(
        functools.partial(_mag_stats_kernel, mmax=mmax),
        out_shape=jax.ShapeDtypeStruct((nS, 2, mmax, 128), jnp.float32),
        grid_spec=pltpu.PrefetchScalarGridSpec(
            num_scalar_prefetch=0,
            grid=(nS,),
            in_specs=[
                pl.BlockSpec(memory_space=pltpu.MemorySpace.SMEM),   # means (2,)
                pl.BlockSpec((2, B, c_in, tS), lambda i: (0, 0, 0, i)),
            ],
            out_specs=pl.BlockSpec((1, 2, mmax, 128), lambda i: (i, 0, 0, 0)),
        ),
        compiler_params=cparams,
    )(means, xr)

    ch_mag = parts_b[:, 0].sum(axis=(0, 2))      # (mmax,)  per-channel sum |z|
    ch_sq = parts_b[:, 1].sum(axis=(0, 2))       # (mmax,)  per-channel sum |z|^2
    if S_pad > S:
        # Each zero-padded spatial position contributes exactly sqrt(mr^2+mi^2)
        # to sum|z| and mr^2+mi^2 to sum|z|^2 per (batch, channel); subtract.
        pad_n = jnp.float32(B * (S_pad - S))
        m2 = means[0] * means[0] + means[1] * means[1]
        ch_mag = ch_mag - pad_n * jnp.sqrt(m2)
        ch_sq = ch_sq - pad_n * m2

    # Per-group statistics via channel prefix sums (groups overlap: always [0:m)).
    pre_mag = jnp.cumsum(ch_mag)
    pre_sq = jnp.cumsum(ch_sq)
    s1 = jnp.stack([pre_mag[m - 1] for m in uniq_mults])      # (n_uniq,)
    s2 = jnp.stack([pre_sq[m - 1] for m in uniq_mults])
    counts = jnp.asarray([float(B * m * S) for m in uniq_mults], jnp.float32)
    var = (s2 - (s1 * s1) / counts) / (counts - 1.0)           # unbiased (ddof=1)
    std = jnp.sqrt(jnp.maximum(var, 0.0))
    inv = (1.0 / (std + jnp.float32(eps))).astype(jnp.float32)  # (n_uniq,)

    # ---- Pass C: normalize (parallel over spatial tiles; lane-dense stores).
    out = pl.pallas_call(
        functools.partial(_normalize_kernel, repr_tuple=repr_tuple,
                          uniq_index=uniq_index, mmax=mmax),
        out_shape=jax.ShapeDtypeStruct((2, B, F, S_pad), x.dtype),
        grid_spec=pltpu.PrefetchScalarGridSpec(
            num_scalar_prefetch=0,
            grid=(nS,),
            in_specs=[
                pl.BlockSpec(memory_space=pltpu.MemorySpace.SMEM),   # means (2,)
                pl.BlockSpec(memory_space=pltpu.MemorySpace.SMEM),   # inv (n_uniq,)
                pl.BlockSpec((2, B, c_in, tS), lambda i: (0, 0, 0, i)),
            ],
            out_specs=pl.BlockSpec((2, B, F, tS), lambda i: (0, 0, 0, i)),
        ),
        compiler_params=cparams,
    )(means, inv, xr)

    if S_pad > S:
        out = out[..., :S]
    return out.reshape(two, B, F, W, H)


def _reference_jax(x, repr_tuple, eps=1e-3):
    """Pure-JAX transcription of the PyTorch forward (for verification)."""
    means = jnp.mean(x, axis=(1, 2, 3, 4), keepdims=True)
    groups = []
    for mult in repr_tuple:
        group = x[:, :, 0:mult, ...] - means      # reference never advances `prev`
        mag = jnp.sqrt(group[0] ** 2 + group[1] ** 2)
        std = jnp.std(mag, ddof=1)
        groups.append(group / (std + eps))
    return jnp.concatenate(groups, axis=2)


if __name__ == "__main__":
    key = jax.random.PRNGKey(0)
    repr_tuple = (2, 2)          # n_features = 4
    eps = 1e-3
    B, F, W, H = 2, sum(repr_tuple), 16, 16

    x = jax.random.normal(key, (2, B, F, W, H), dtype=jnp.float32)

    gnorm = jax.jit(functools.partial(group_norm_2d, repr_tuple=repr_tuple, eps=eps))
    y = gnorm(x)
    jax.block_until_ready(y)

    y_ref = _reference_jax(x, repr_tuple, eps=eps)
    if not jnp.allclose(y, y_ref, atol=1e-4, rtol=1e-4):
        max_err = jnp.max(jnp.abs(y - y_ref))
        raise AssertionError(
            "Pallas kernel output mismatch vs. JAX reference "
            "(max abs err = {})".format(max_err))

    print("KERNEL_OK")
</pallas_src>

<mosaic_0001>
module attributes {stable_mosaic.version = 11 : i64} {
  func.func @_component_sum_kernel(%arg0: i32, %arg1: memref<2x8x128xf32, #tpu.memory_space<vmem>>, %arg2: memref<1x2x128xf32, #tpu.memory_space<vmem>>) attributes {dimension_semantics = [#tpu.dimension_semantics<parallel>], iteration_bounds = array<i64: 2>, scalar_prefetch = 0 : i64, scratch_operands = 0 : i64, tpu.core_type = #tpu.core_type<tc>, window_params = [{transform_indices = @transform_0, window_bounds = array<i64: 2, 8, 128>}, {transform_indices = @transform_1, window_bounds = array<i64: 1, 2, 128>}]} {
    %c0 = arith.constant 0 : index
    %c0_0 = arith.constant 0 : index
    %c0_1 = arith.constant 0 : index
    %0 = vector.load %arg1[%c0, %c0_0, %c0_1] : memref<2x8x128xf32, #tpu.memory_space<vmem>>, vector<2x8x128xf32>
    %1 = vector.shape_cast %0 : vector<2x8x128xf32> to vector<2x8x1x128xf32>
    %cst = arith.constant dense<0.000000e+00> : vector<2x128xf32>
    %2 = vector.multi_reduction <add>, %1, %cst [1, 2] : vector<2x8x1x128xf32> to vector<2x128xf32>
    %c0_2 = arith.constant 0 : index
    %c0_3 = arith.constant 0 : index
    %c0_4 = arith.constant 0 : index
    %3 = vector.load %arg2[%c0_2, %c0_3, %c0_4] : memref<1x2x128xf32, #tpu.memory_space<vmem>>, vector<1x2x128xf32>
    %4 = vector.shape_cast %3 : vector<1x2x128xf32> to vector<2x128xf32>
    %5 = vector.shape_cast %2 : vector<2x128xf32> to vector<1x2x128xf32>
    tpu.vector_store %arg2[%c0_2, %c0_3, %c0_4], %5 {strides = array<i32>} : memref<1x2x128xf32, #tpu.memory_space<vmem>>, vector<1x2x128xf32>,
    return
  }
  func.func @transform_0(%arg0: i32) -> (i32, i32, i32) {
    %c0_i32 = arith.constant 0 : i32
    %c0_i32_0 = arith.constant 0 : i32
    %c0_i32_1 = arith.constant 0 : i32
    return %c0_i32, %c0_i32_0, %arg0 : i32, i32, i32
  }
  func.func @transform_1(%arg0: i32) -> (i32, i32, i32) {
    %c0_i32 = arith.constant 0 : i32
    %c0_i32_0 = arith.constant 0 : i32
    %c0_i32_1 = arith.constant 0 : i32
    return %arg0, %c0_i32, %c0_i32_0 : i32, i32, i32
  }
}

module attributes {stable_mosaic.version = 11 : i64} {
  func.func @_mag_stats_kernel(%arg0: i32, %arg1: memref<2xf32, #tpu.memory_space<smem>>, %arg2: memref<2x2x4x128xf32, #tpu.memory_space<vmem>>, %arg3: memref<1x2x2x128xf32, #tpu.memory_space<vmem>>) attributes {dimension_semantics = [#tpu.dimension_semantics<parallel>], iteration_bounds = array<i64: 2>, scalar_prefetch = 0 : i64, scratch_operands = 0 : i64, tpu.core_type = #tpu.core_type<tc>, window_params = [{transform_indices = @transform_0, window_bounds = array<i64: 2>}, {transform_indices = @transform_1, window_bounds = array<i64: 2, 2, 4, 128>}, {transform_indices = @transform_2, window_bounds = array<i64: 1, 2, 2, 128>}]} {
    %c0 = arith.constant 0 : index
    %0 = memref.load %arg1[%c0] : memref<2xf32, #tpu.memory_space<smem>>
    %c1 = arith.constant 1 : index
    %1 = memref.load %arg1[%c1] : memref<2xf32, #tpu.memory_space<smem>>
    %c0_0 = arith.constant 0 : index
    %c0_1 = arith.constant 0 : index
    %c0_2 = arith.constant 0 : index
    %c0_3 = arith.constant 0 : index
    %2 = vector.load %arg2[%c0_0, %c0_1, %c0_2, %c0_3] : memref<2x2x4x128xf32, #tpu.memory_space<vmem>>, vector<2x2x2x128xf32>
    %3 = vector.extract_strided_slice %2 {offsets = [0, 0, 0, 0], sizes = [1, 2, 2, 128], strides = [1, 1, 1, 1]} : vector<2x2x2x128xf32> to vector<1x2x2x128xf32>
    %4 = vector.shape_cast %3 : vector<1x2x2x128xf32> to vector<2x2x128xf32>
    %5 = vector.broadcast %0 : f32 to vector<2x2x128xf32>
    %6 = arith.subf %4, %5 : vector<2x2x128xf32>
    %7 = vector.extract_strided_slice %2 {offsets = [1, 0, 0, 0], sizes = [1, 2, 2, 128], strides = [1, 1, 1, 1]} : vector<2x2x2x128xf32> to vector<1x2x2x128xf32>
    %8 = vector.shape_cast %7 : vector<1x2x2x128xf32> to vector<2x2x128xf32>
    %9 = vector.broadcast %1 : f32 to vector<2x2x128xf32>
    %10 = arith.subf %8, %9 : vector<2x2x128xf32>
    %11 = arith.mulf %6, %6 : vector<2x2x128xf32>
    %12 = arith.mulf %10, %10 : vector<2x2x128xf32>
    %13 = arith.addf %11, %12 : vector<2x2x128xf32>
    %14 = math.sqrt %13 : vector<2x2x128xf32>
    %15 = vector.shape_cast %14 : vector<2x2x128xf32> to vector<2x2x1x128xf32>
    %cst = arith.constant dense<0.000000e+00> : vector<2x128xf32>
    %16 = vector.multi_reduction <add>, %15, %cst [0, 2] : vector<2x2x1x128xf32> to vector<2x128xf32>
    %c0_4 = arith.constant 0 : index
    %c0_5 = arith.constant 0 : index
    %c0_6 = arith.constant 0 : index
    %c0_7 = arith.constant 0 : index
    %17 = vector.load %arg3[%c0_4, %c0_5, %c0_6, %c0_7] : memref<1x2x2x128xf32, #tpu.memory_space<vmem>>, vector<1x1x2x128xf32>
    %18 = vector.shape_cast %17 : vector<1x1x2x128xf32> to vector<2x128xf32>
    %19 = vector.shape_cast %16 : vector<2x128xf32> to vector<1x1x2x128xf32>
    tpu.vector_store %arg3[%c0_4, %c0_5, %c0_6, %c0_7], %19 {strides = array<i32>} : memref<1x2x2x128xf32, #tpu.memory_space<vmem>>, vector<1x1x2x128xf32>,
    %20 = vector.shape_cast %13 : vector<2x2x128xf32> to vector<2x2x1x128xf32>
    %cst_8 = arith.constant dense<0.000000e+00> : vector<2x128xf32>
    %21 = vector.multi_reduction <add>, %20, %cst_8 [0, 2] : vector<2x2x1x128xf32> to vector<2x128xf32>
    %c0_9 = arith.constant 0 : index
    %c1_10 = arith.constant 1 : index
    %c0_11 = arith.constant 0 : index
    %c0_12 = arith.constant 0 : index
    %22 = vector.load %arg3[%c0_9, %c1_10, %c0_11, %c0_12] : memref<1x2x2x128xf32, #tpu.memory_space<vmem>>, vector<1x1x2x128xf32>
    %23 = vector.shape_cast %22 : vector<1x1x2x128xf32> to vector<2x128xf32>
    %24 = vector.shape_cast %21 : vector<2x128xf32> to vector<1x1x2x128xf32>
    tpu.vector_store %arg3[%c0_9, %c1_10, %c0_11, %c0_12], %24 {strides = array<i32>} : memref<1x2x2x128xf32, #tpu.memory_space<vmem>>, vector<1x1x2x128xf32>,
    return
  }
  func.func @transform_0(%arg0: i32) -> i32 {
    %c0_i32 = arith.constant 0 : i32
    %c0_i32_0 = arith.constant 0 : i32
    return %c0_i32 : i32
  }
  func.func @transform_1(%arg0: i32) -> (i32, i32, i32, i32) {
    %c0_i32 = arith.constant 0 : i32
    %c0_i32_0 = arith.constant 0 : i32
    %c0_i32_1 = arith.constant 0 : i32
    %c0_i32_2 = arith.constant 0 : i32
    return %c0_i32, %c0_i32_0, %c0_i32_1, %arg0 : i32, i32, i32, i32
  }
  func.func @transform_2(%arg0: i32) -> (i32, i32, i32, i32) {
    %c0_i32 = arith.constant 0 : i32
    %c0_i32_0 = arith.constant 0 : i32
    %c0_i32_1 = arith.constant 0 : i32
    %c0_i32_2 = arith.constant 0 : i32
    return %arg0, %c0_i32, %c0_i32_0, %c0_i32_1 : i32, i32, i32, i32
  }
}

module attributes {stable_mosaic.version = 11 : i64} {
  func.func @_normalize_kernel(%arg0: i32, %arg1: memref<2xf32, #tpu.memory_space<smem>>, %arg2: memref<1xf32, #tpu.memory_space<smem>>, %arg3: memref<2x2x4x128xf32, #tpu.memory_space<vmem>>, %arg4: memref<2x2x4x128xf32, #tpu.memory_space<vmem>>) attributes {dimension_semantics = [#tpu.dimension_semantics<parallel>], iteration_bounds = array<i64: 2>, scalar_prefetch = 0 : i64, scratch_operands = 0 : i64, tpu.core_type = #tpu.core_type<tc>, window_params = [{transform_indices = @transform_0, window_bounds = array<i64: 2>}, {transform_indices = @transform_1, window_bounds = array<i64: 1>}, {transform_indices = @transform_2, window_bounds = array<i64: 2, 2, 4, 128>}, {transform_indices = @transform_3, window_bounds = array<i64: 2, 2, 4, 128>}]} {
    %c0 = arith.constant 0 : index
    %0 = memref.load %arg1[%c0] : memref<2xf32, #tpu.memory_space<smem>>
    %c1 = arith.constant 1 : index
    %1 = memref.load %arg1[%c1] : memref<2xf32, #tpu.memory_space<smem>>
    %c0_0 = arith.constant 0 : index
    %c0_1 = arith.constant 0 : index
    %c0_2 = arith.constant 0 : index
    %c0_3 = arith.constant 0 : index
    %2 = vector.load %arg3[%c0_0, %c0_1, %c0_2, %c0_3] : memref<2x2x4x128xf32, #tpu.memory_space<vmem>>, vector<2x2x2x128xf32>
    %3 = vector.extract_strided_slice %2 {offsets = [0, 0, 0, 0], sizes = [1, 2, 2, 128], strides = [1, 1, 1, 1]} : vector<2x2x2x128xf32> to vector<1x2x2x128xf32>
    %4 = vector.shape_cast %3 : vector<1x2x2x128xf32> to vector<2x2x128xf32>
    %5 = vector.broadcast %0 : f32 to vector<2x2x128xf32>
    %6 = arith.subf %4, %5 : vector<2x2x128xf32>
    %7 = vector.extract_strided_slice %2 {offsets = [1, 0, 0, 0], sizes = [1, 2, 2, 128], strides = [1, 1, 1, 1]} : vector<2x2x2x128xf32> to vector<1x2x2x128xf32>
    %8 = vector.shape_cast %7 : vector<1x2x2x128xf32> to vector<2x2x128xf32>
    %9 = vector.broadcast %1 : f32 to vector<2x2x128xf32>
    %10 = arith.subf %8, %9 : vector<2x2x128xf32>
    %c0_4 = arith.constant 0 : index
    %11 = memref.load %arg2[%c0_4] : memref<1xf32, #tpu.memory_space<smem>>
    %12 = vector.broadcast %11 : f32 to vector<2x2x128xf32>
    %13 = arith.mulf %6, %12 : vector<2x2x128xf32>
    %14 = vector.broadcast %11 : f32 to vector<2x2x128xf32>
    %15 = arith.mulf %10, %14 : vector<2x2x128xf32>
    %c0_5 = arith.constant 0 : index
    %c0_6 = arith.constant 0 : index
    %c0_7 = arith.constant 0 : index
    %c0_8 = arith.constant 0 : index
    %16 = vector.load %arg4[%c0_5, %c0_6, %c0_7, %c0_8] : memref<2x2x4x128xf32, #tpu.memory_space<vmem>>, vector<1x2x2x128xf32>
    %17 = vector.shape_cast %16 : vector<1x2x2x128xf32> to vector<2x2x128xf32>
    %18 = vector.shape_cast %13 : vector<2x2x128xf32> to vector<1x2x2x128xf32>
    tpu.vector_store %arg4[%c0_5, %c0_6, %c0_7, %c0_8], %18 {strides = array<i32>} : memref<2x2x4x128xf32, #tpu.memory_space<vmem>>, vector<1x2x2x128xf32>,
    %c1_9 = arith.constant 1 : index
    %c0_10 = arith.constant 0 : index
    %c0_11 = arith.constant 0 : index
    %c0_12 = arith.constant 0 : index
    %19 = vector.load %arg4[%c1_9, %c0_10, %c0_11, %c0_12] : memref<2x2x4x128xf32, #tpu.memory_space<vmem>>, vector<1x2x2x128xf32>
    %20 = vector.shape_cast %19 : vector<1x2x2x128xf32> to vector<2x2x128xf32>
    %21 = vector.shape_cast %15 : vector<2x2x128xf32> to vector<1x2x2x128xf32>
    tpu.vector_store %arg4[%c1_9, %c0_10, %c0_11, %c0_12], %21 {strides = array<i32>} : memref<2x2x4x128xf32, #tpu.memory_space<vmem>>, vector<1x2x2x128xf32>,
    %c0_13 = arith.constant 0 : index
    %c0_14 = arith.constant 0 : index
    %c2 = arith.constant 2 : index
    %c0_15 = arith.constant 0 : index
    %22 = vector.load %arg4[%c0_13, %c0_14, %c2, %c0_15] : memref<2x2x4x128xf32, #tpu.memory_space<vmem>>, vector<1x2x2x128xf32>
    %23 = vector.shape_cast %22 : vector<1x2x2x128xf32> to vector<2x2x128xf32>
    %24 = vector.shape_cast %13 : vector<2x2x128xf32> to vector<1x2x2x128xf32>
    tpu.vector_store %arg4[%c0_13, %c0_14, %c2, %c0_15], %24 {strides = array<i32>} : memref<2x2x4x128xf32, #tpu.memory_space<vmem>>, vector<1x2x2x128xf32>,
    %c1_16 = arith.constant 1 : index
    %c0_17 = arith.constant 0 : index
    %c2_18 = arith.constant 2 : index
    %c0_19 = arith.constant 0 : index
    %25 = vector.load %arg4[%c1_16, %c0_17, %c2_18, %c0_19] : memref<2x2x4x128xf32, #tpu.memory_space<vmem>>, vector<1x2x2x128xf32>
    %26 = vector.shape_cast %25 : vector<1x2x2x128xf32> to vector<2x2x128xf32>
    %27 = vector.shape_cast %15 : vector<2x2x128xf32> to vector<1x2x2x128xf32>
    tpu.vector_store %arg4[%c1_16, %c0_17, %c2_18, %c0_19], %27 {strides = array<i32>} : memref<2x2x4x128xf32, #tpu.memory_space<vmem>>, vector<1x2x2x128xf32>,
    return
  }
  func.func @transform_0(%arg0: i32) -> i32 {
    %c0_i32 = arith.constant 0 : i32
    %c0_i32_0 = arith.constant 0 : i32
    return %c0_i32 : i32
  }
  func.func @transform_1(%arg0: i32) -> i32 {
    %c0_i32 = arith.constant 0 : i32
    %c0_i32_0 = arith.constant 0 : i32
    return %c0_i32 : i32
  }
  func.func @transform_2(%arg0: i32) -> (i32, i32, i32, i32) {
    %c0_i32 = arith.constant 0 : i32
    %c0_i32_0 = arith.constant 0 : i32
    %c0_i32_1 = arith.constant 0 : i32
    %c0_i32_2 = arith.constant 0 : i32
    return %c0_i32, %c0_i32_0, %c0_i32_1, %arg0 : i32, i32, i32, i32
  }
  func.func @transform_3(%arg0: i32) -> (i32, i32, i32, i32) {
    %c0_i32 = arith.constant 0 : i32
    %c0_i32_0 = arith.constant 0 : i32
    %c0_i32_1 = arith.constant 0 : i32
    %c0_i32_2 = arith.constant 0 : i32
    return %c0_i32, %c0_i32_0, %c0_i32_1, %arg0 : i32, i32, i32, i32
  }
}

</mosaic_0001>

<bundles_post_ra>
// kernel: group_norm_2d.3
= control target key start
LH: loop header
LB: loop body
LE: loop exit
PB: predicated region body
PF: predicated region fallthrough
CT: control target
= control target key end

     0   :  { %s452_s6 = smov 0   ;;  %s454_s7 = smov 0   ;;  %s522_s0 = inlined_call_operand.vmem [shape: f32[2,8,256], index: 0, kind: input, shape index: {}]   ;;  %s523_s1 = inlined_call_operand.vmem [shape: f32[2,2,128], index: 1, kind: output, shape index: {}]  }
   0x1   :  { %s456_s8 = smov 0  }
   0x2 LB: > { %s379_s9 = sadd.s32 4294967295, %s439_s8   ;;  %s469_s10 = sadd.s32 1, %s439_s8   ;;  %s439_s8 = sphi %s456_s8, %s526_s8   ;;  %s435_s7 = sphi %s454_s7, %s525_s7   ;;  %s431_s6 = sphi %s452_s6, %s524_s6  }
   0x3   : > { %s15_s11 = ssub.s32 %s439_s8, %s469_s10  ;;  %s18_s12 = sadd.s32 1, %s435_s7 }
   0x4   : > { %p16_p0 = scmp.eq.s32.totalorder %s15_s11, 0  ;;  %p25_p1 = scmp.ne.s32.totalorder %s435_s7, %s431_s6 }
   0x5   : > { %p26_p2 = scmp.eq.s32.totalorder %s439_s8, 0  ;;  %p382_p4 = scmp.ge.s32.totalorder %s439_s8, 2 }
   0x6   : > { %s478_s13 = scalar_select %p16_p0, %s435_s7, %s18_s12  }
   0x7   : > { %p27_p3 = por %p26_p2, %p25_p1  ;;  %77 = sbr.rel (%p382_p4) target bundleno = 21 (0x15), region = 16 }
   0xe   : > { %80 = sbr.rel (!%p27_p3) target bundleno = 21 (0x15), region = 20  ;;  %s82_s14 = sand.u32 (%p27_p3), 1, %s435_s7  }
   0xf   : > { %s384_s15 = sshll.u32 (%p27_p3), %s439_s8, 3  ;;  %s383_s16 = sshll.u32 (%p27_p3), %s82_s14, 4 }
  0x10   : > { %s86_s19 = scalar_lea.vmem (%p27_p3), %s522_s0, %s384_s15  ;;  %s84_s20 = scalar_lea.vmem (%p27_p3), [#allocation2], %s383_s16 }
  0x11   : > { %v116_v0 = vld [vmem:[%s86_s19] sm:$0xff] (%p27_p3)  ;;  %v118_v1 = vld [vmem:[%s86_s19 + $0x10] sm:$0xff] (%p27_p3) }
  0x12   : > { %117 = vst [vmem:[%s84_s20] sm:$0xff] (%p27_p3), %v116_v0  ;;  %119 = vst [vmem:[%s84_s20 + $0x8] sm:$0xff] (%p27_p3), %v118_v1 }
  0x15 PF: > { %p385_p5 = scmp.ge.s32.totalorder %s439_s8, 1  ;;  %p124_p6 = scmp.lt.s32.totalorder %s439_s8, 3 }
  0x17   : > { %p125_p7 = pnand %p385_p5, %p124_p6 }
  0x18   : > { %s131_s21 = sand.u32 (!%p125_p7), 1, %s431_s6   ;;  %v161_v2 = vlaneseq (!%p125_p7)  ;;  %v441_v3 = vmov (!%p125_p7), 1966171168   ;;  %vm271_vm0 = vcmask (!%p125_p7), 1040384   ;;  %p149_p8 = scmp.lt.s32.totalorder (!%p125_p7), %s379_s9, 1  ;;  %vm316_vm1 = vcmask (!%p125_p7), 1041409  }
  0x19   : > { %128 = sbr.rel (%p125_p7) target bundleno = 67 (0x43), region = 58  ;;  %s386_s22 = sshll.u32 (!%p125_p7), %s131_s21, 4  ;;  %v159_v4 = vunpack.c.l.s4 (!%p125_p7), %v441_v3 }
  0x1a   : > { %v162_v5 = vshrl.u32 (!%p125_p7), %v161_v2, 7  ;;  %s133_s23 = scalar_lea.vmem (!%p125_p7), [#allocation2], %s386_s22 }
  0x1b   : > { %v153_v6 = vld [vmem:[%s133_s23] sm:$0xff] (!%p125_p7)  ;;  %v160_v7 = vunpack.c.0.s8 (!%p125_p7), %v159_v4  ;;  %v154_v8 = vld [vmem:[%s133_s23 + $0x8] sm:$0xff] (!%p125_p7) }
  0x1c   : > { %v157_v9 = vcombine.high (!%p125_p7), %v153_v6, %v153_v6  ;;  %v206_v11 = vcombine.high (!%p125_p7), %v154_v8, %v154_v8 }
  0x1d   : > { %v163_v10 = vsub.s32 (!%p125_p7), %v160_v7, %v162_v5 }
  0x1f   : > { %v164_v12 = vrot.slane (!%p125_p7), %v153_v6, %v163_v10  ;;  %v171_v13 = vrot.slane (!%p125_p7), %v157_v9, %v163_v10  ;;  %v213_v14 = vrot.slane (!%p125_p7), %v154_v8, %v163_v10  ;;  %v220_v17 = vrot.slane (!%p125_p7), %v206_v11, %v163_v10 }
  0x20   : > { %s528_s9 = smov (!%p149_p8, %s379_s9), 1 }
  0x21   : > { %v172_v15 = vcombine.high %v164_v12, %v164_v12  ;;  %v180_v16 = vrot.slane %v164_v12, %v163_v10  ;;  %v221_v18 = vcombine.high %v213_v14, %v213_v14  ;;  %v229_v19 = vrot.slane %v213_v14, %v163_v10  ;;  %s387_s24 = sshll.u32 %s528_s9, 1 }
  0x22   : > { %v173_v20 = vcombine.high %v171_v13, %v171_v13  ;;  %v187_v23 = vrot.slane %v171_v13, %v163_v10  ;;  %v222_v29 = vcombine.high %v220_v17, %v220_v17  ;;  %v236_v35 = vrot.slane %v220_v17, %v163_v10  ;;  %s152_s27 = scalar_lea.vmem %s523_s1, %s387_s24 }
  0x23   : > { %v194_v21 = vrot.slane %v172_v15, %v163_v10  ;;  %v202_v22 = vcombine.high %v180_v16, %v180_v16  ;;  %v243_v24 = vrot.slane %v221_v18, %v163_v10  ;;  %v251_v26 = vcombine.high %v229_v19, %v229_v19 }
  0x24   : > { %v272_v27 = vsel %vm271_vm0, %v180_v16, 0.0  ;;  %v201_v33 = vrot.slane %v173_v20, %v163_v10  ;;  %v293_v37 = vsel %vm271_vm0, %v229_v19, 0.0  ;;  %v203_v39 = vcombine.high %v187_v23, %v187_v23 }
  0x25   : > { %v204_v25 = vcombine.high %v194_v21, %v194_v21  ;;  %v273_v28 = vsel %vm271_vm0, %v194_v21, 0.0  ;;  %v253_v30 = vcombine.high %v243_v24, %v243_v24  ;;  %v275_v32 = vsel %vm271_vm0, %v202_v22, 0.0 }
  0x26   : > { %v274_v31 = vadd.f32 %v273_v28, %v272_v27  ;;  %v294_v38 = vsel %vm271_vm0, %v243_v24, 0.0  ;;  %v279_v40 = vsel %vm271_vm0, %v187_v23, 0.0  ;;  %v296_v42 = vsel %vm271_vm0, %v251_v26, 0.0 }
  0x27   : > { %v277_v34 = vsel %vm271_vm0, %v204_v25, 0.0  ;;  %v295_v41 = vadd.f32 %v294_v38, %v293_v37  ;;  %v250_v43 = vrot.slane %v222_v29, %v163_v10  ;;  %v298_v45 = vsel %vm271_vm0, %v253_v30, 0.0 }
  0x28   : > { %v276_v36 = vadd.f32 %v275_v32, %v274_v31  ;;  %v205_v46 = vcombine.high %v201_v33, %v201_v33  ;;  %v281_v47 = vsel %vm271_vm0, %v201_v33, 0.0  ;;  %v252_v49 = vcombine.high %v236_v35, %v236_v35 }
  0x29   : > { %v297_v48 = vadd.f32 %v296_v42, %v295_v41  ;;  %v300_v51 = vsel %vm271_vm0, %v236_v35, 0.0  ;;  %v283_v52 = vsel %vm271_vm0, %v203_v39, 0.0  ;;  %v254_v54 = vcombine.high %v250_v43, %v250_v43 }
  0x2a   : > { %v278_v44 = vadd.f32 %v277_v34, %v276_v36  ;;  %v302_v56 = vsel %vm271_vm0, %v250_v43, 0.0  ;;  %v285_v57 = vsel %vm271_vm0, %v205_v46, 0.0  ;;  %v304_v60 = vsel %vm271_vm0, %v252_v49, 0.0 }
  0x2b   : > { %v299_v53 = vadd.f32 %v298_v45, %v297_v48  ;;  %v306_v63 = vsel %vm271_vm0, %v254_v54, 0.0 }
  0x2c   : > { %v280_v50 = vadd.f32 %v279_v40, %v278_v44 }
  0x2d   : > { %v301_v58 = vadd.f32 %v300_v51, %v299_v53 }
  0x2e   : > { %v282_v55 = vadd.f32 %v281_v47, %v280_v50 }
  0x2f   : > { %v303_v61 = vadd.f32 %v302_v56, %v301_v58 }
  0x30   : > { %v284_v59 = vadd.f32 %v283_v52, %v282_v55 }
  0x31   : > { %v305_v0 = vadd.f32 %v304_v60, %v303_v61 }
  0x32   : > { %v286_v62 = vadd.f32 %v285_v57, %v284_v59 }
  0x33   : > { %v307_v2 = vadd.f32 %v306_v63, %v305_v0 }
  0x34   : > { %v287_v1 = vrot.slane %v286_v62, 4 }
  0x35   : > { %v308_v4 = vrot.slane %v307_v2, 4 }
  0x36   : > { %v288_v3 = vadd.f32 %v287_v1, %v286_v62 }
  0x37   : > { %v309_v6 = vadd.f32 %v308_v4, %v307_v2 }
  0x38   : > { %v289_v5 = vrot.slane %v288_v3, 2 }
  0x39   : > { %v310_v8 = vrot.slane %v309_v6, 2 }
  0x3a   : > { %v290_v7 = vadd.f32 %v289_v5, %v288_v3 }
  0x3b   : > { %v311_v10 = vadd.f32 %v310_v8, %v309_v6 }
  0x3c   : > { %v291_v9 = vrot.slane %v290_v7, 1 }
  0x3d   : > { %v312_v12 = vrot.slane %v311_v10, 1 }
  0x3e   : > { %v292_v11 = vadd.f32 %v291_v9, %v290_v7 }
  0x3f   : > { %v313_v13 = vadd.f32 %v312_v12, %v311_v10 }
  0x41   : > { %v317_v14 = vsel %vm316_vm1, %v313_v13, %v292_v11 }
  0x42   : > { %319 = vst [vmem:[%s152_s27] sm:$0x3] %v317_v14 }
  0x43 PF: > { %p8_p9 = scmp.ge.s32.totalorder %s469_s10, 4   ;;  %s524_s6 = smov %s435_s7 }
  0x44   : > { %s525_s7 = smov %s478_s13  ;;  %s526_s8 = smov %s469_s10 }
  0x45   :  { %10 = sbr.rel (!%p8_p9) target bundleno = 2 (0x2), region = 97 }

// kernel: group_norm_2d.4
= control target key start
LH: loop header
LB: loop body
LE: loop exit
PB: predicated region body
PF: predicated region fallthrough
CT: control target
= control target key end

     0   :  { %7 = vsyncpa [#allocation3], 0  ;;  %s582_s9 = smov 0   ;;  %s584_s10 = smov 0   ;;  %s672_s0 = inlined_call_operand.vmem [shape: f32[2], index: 0, kind: input, shape index: {}]   ;;  %s673_s1 = inlined_call_operand.vmem [shape: f32[2,2,4,256], index: 1, kind: input, shape index: {}]   ;;  %s674_s2 = inlined_call_operand.vmem [shape: f32[2,2,2,128], index: 2, kind: output, shape index: {}]  }
   0x1   :  { %s586_s11 = smov 0  }
   0x2 LB: > { %s598_s12 = sadd.s32 4294967295, %s563_s11   ;;  %s601_s13 = sadd.s32 1, %s563_s11   ;;  %s563_s11 = sphi %s586_s11, %s679_s11   ;;  %s559_s10 = sphi %s584_s10, %s678_s10   ;;  %s555_s9 = sphi %s582_s9, %s677_s9  }
   0x3   : > { %s38_s14 = ssub.s32 %s563_s11, %s601_s13  ;;  %s41_s15 = sadd.s32 1, %s559_s10 }
   0x4   : > { %p39_p0 = scmp.eq.s32.totalorder %s38_s14, 0  ;;  %p48_p1 = scmp.ne.s32.totalorder %s559_s10, %s555_s9 }
   0x5   : > { %p49_p2 = scmp.eq.s32.totalorder %s563_s11, 0  ;;  %p467_p3 = scmp.ge.s32.totalorder %s563_s11, 1 }
   0x6   : > { %s611_s16 = scalar_select %p39_p0, %s559_s10, %s41_s15  }
   0x7   : > { %p613_p4 = por %p49_p2, %p48_p1  ;;  %p91_p5 = scmp.lt.s32.totalorder %s563_s11, 3 }
   0x8   : > { %p490_p6 = scmp.eq.s32.totalorder %s598_s12, 0  ;;  %s104_s21 = sshll.u32 %s672_s0, 4  ;;  %s105_s21 = int_to_ptr.vmem [resolvable:$true] %s104_s21 }
   0x9   : > { %p619_p7 = pnand %p467_p3, %p91_p5  ;;  %s522_s22 = scalar_lea.vmem %s105_s21, 16 }
   0xa   : > { %p523_p10 = scmp.ne.s32.totalorder %s105_s21, %s522_s22  ;;  %p530_p0 = scmp.lt.s32.totalorder %s105_s21, %s105_s21 }
   0xb   : > { %p486_p8 = pneg %p619_p7  ;;  %p531_p1 = scmp.lt.s32.totalorder %s522_s22, %s522_s22 }
   0xd   : > { %p487_p9 = pnand %p490_p6, %p486_p8  ;;  %p532_p2 = por %p531_p1, %p530_p0 }
   0xf   : > { %p524_p11 = pneg %p487_p9 }
  0x11   : > { %p525_p12 = pnand %p524_p11, %p523_p10 }
  0x13   : > { %p526_p13 = pneg %p525_p12 }
  0x15   : > { %p533_p3 = pnand %p532_p2, %p526_p13 }
  0x17   : > { %536 = shalt.err (!%p533_p3)
}
  0x18   : > { %s565_s23 = smov [#allocation2]   ;;  %p469_p5 = scmp.ge.s32.totalorder %s563_s11, 2 }
  0x19   : > { %489 = dma.vmem_to_smem (!%p487_p9), %s105_s21, 16, %s565_s23, [#allocation3]  }
  0x1a   : > { %111 = sbr.rel (%p469_p5) target bundleno = 40 (0x28), region = 20 }
  0x21   : > { %114 = sbr.rel (!%p613_p4) target bundleno = 40 (0x28), region = 24  ;;  %s116_s24 = sand.u32 (%p613_p4), 1, %s559_s10  }
  0x22   : > { %s471_s25 = sshll.u32 (%p613_p4), %s563_s11, 2  ;;  %s470_s26 = sshll.u32 (%p613_p4), %s116_s24, 4 }
  0x23   : > { %s120_s29 = scalar_lea.vmem (%p613_p4), %s673_s1, %s471_s25  ;;  %s118_s30 = scalar_lea.vmem (%p613_p4), [#allocation4], %s470_s26 }
  0x24   : > { %v136_v0 = vld [vmem:[%s120_s29] sm:$0xf] (%p613_p4)  ;;  %v138_v1 = vld [vmem:[%s120_s29 + $0x8] sm:$0xf] (%p613_p4)  ;;  %v140_v2 = vld [vmem:[%s120_s29 + $0x10] sm:$0xf] (%p613_p4) }
  0x25   : > { %137 = vst [vmem:[%s118_s30] sm:$0xf] (%p613_p4), %v136_v0  ;;  %139 = vst [vmem:[%s118_s30 + $0x4] sm:$0xf] (%p613_p4), %v138_v1  ;;  %v142_v3 = vld [vmem:[%s120_s29 + $0x18] sm:$0xf] (%p613_p4) }
  0x26   : > { %141 = vst [vmem:[%s118_s30 + $0x8] sm:$0xf] (%p613_p4), %v140_v2  ;;  %143 = vst [vmem:[%s118_s30 + $0xc] sm:$0xf] (%p613_p4), %v142_v3 }
  0x28 PF: > { %177 = sbr.rel (%p619_p7) target bundleno = 104 (0x68), region = 65 }
  0x2f   : > { %550 = dma.done.wait (%p490_p6), [#allocation3], 16  }
  0x30   : > { %552 = vsyncadd (%p490_p6), [#allocation3], 4294967280  ;;  %s184_s3 = sand.u32 1, %s555_s9  }
  0x31   : > { %s474_s4 = sshll.u32 %s184_s3, 4 }
  0x32   : > { %s186_s5 = scalar_lea.vmem [#allocation4], %s474_s4 }
  0x33   : > { %190 = sfence }
  0x34   : > { %s211_s6 = sld [smem:[#allocation2]]  ;;  %s477_s7 = sld [smem:[#allocation2 + $0x1]]  ;;  %v213_v4 = vld [vmem:[%s186_s5] sm:$0x3]  ;;  %v214_v5 = vld [vmem:[%s186_s5 + $0x4] sm:$0x3]  ;;  %v248_v8 = vlaneseq }
  0x35   : > { %v566_v6 = vmov 1966171168   ;;  %v215_v9 = vld [vmem:[%s186_s5 + $0x8] sm:$0x3]  ;;  %v216_v10 = vld [vmem:[%s186_s5 + $0xc] sm:$0x3] }
  0x36   : > { %v246_v7 = vunpack.c.l.s4 %v566_v6  ;;  %v249_v18 = vshrl.u32 %v248_v8, 7  ;;  %vm293_vm0 = vcmask 1040384   ;;  %p206_p4 = scmp.lt.s32.totalorder %s598_s12, 1  ;;  %vm314_vm5 = vcmask 1041409  }
  0x38   : > { %v247_v17 = vunpack.c.0.s8 %v246_v7  ;;  %s681_s12 = smov (!%p206_p4, %s598_s12), 1 }
  0x39   : > { %s481_s8 = sshll.u32 %s681_s12, 2 }
  0x3a   : > { %v217_v11 = vstv %s211_s6  ;;  %v220_v14 = vstv %s477_s7  ;;  %v250_v25 = vsub.s32 %v247_v17, %v249_v18  ;;  %s210_s14 = scalar_lea.vmem %s674_s2, %s481_s8 }
  0x3b   : > { %v218_v12 = vsub.f32 %v213_v4, %v217_v11  ;;  %v219_v13 = vsub.f32 %v214_v5, %v217_v11  ;;  %v221_v15 = vsub.f32 %v215_v9, %v220_v14  ;;  %v222_v16 = vsub.f32 %v216_v10, %v220_v14 }
  0x3d   : > { %v223_v19 = vmul.f32 %v218_v12, %v218_v12  ;;  %v224_v20 = vmul.f32 %v219_v13, %v219_v13  ;;  %v225_v21 = vmul.f32 %v221_v15, %v221_v15  ;;  %v226_v22 = vmul.f32 %v222_v16, %v222_v16 }
  0x3f   : > { %v227_v23 = vadd.f32 %v225_v21, %v223_v19  ;;  %v228_v24 = vadd.f32 %v226_v22, %v224_v20 }
  0x41   : > { %518 = vrsqrt.f32 %v227_v23  ;;  %v326_v26 = vrot.slane %v227_v23, %v250_v25  ;;  %v348_v27 = vrot.slane %v228_v24, %v250_v25  ;;  %vm231_vm1 = vcmp.eq.f32.partialorder %v227_v23, inf }
  0x42   : > { %520 = vrsqrt.f32 %v228_v24  ;;  %vm233_vm2 = vcmp.eq.f32.partialorder %v227_v23, 0.0  ;;  %v234_v42 = vand.u32 2147483648, %v227_v23  ;;  %vm238_vm3 = vcmp.eq.f32.partialorder %v228_v24, inf }
  0x43   : > { %v327_v28 = vcombine.high %v326_v26, %v326_v26  ;;  %v334_v29 = vrot.slane %v326_v26, %v250_v25  ;;  %v349_v30 = vcombine.high %v348_v27, %v348_v27  ;;  %v356_v31 = vrot.slane %v348_v27, %v250_v25 }
  0x44   : > { %v241_v45 = vand.u32 2147483648, %v228_v24  ;;  %vm240_vm4 = vcmp.eq.f32.partialorder %v228_v24, 0.0 }
  0x45   : > { %v341_v32 = vrot.slane %v327_v28, %v250_v25  ;;  %v363_v33 = vrot.slane %v349_v30, %v250_v25  ;;  %v368_v34 = vsel %vm293_vm0, %v334_v29, 0.0  ;;  %v369_v35 = vsel %vm293_vm0, %v356_v31, 0.0 }
  0x46   : > { %v370_v36 = vadd.f32 %v369_v35, %v368_v34 }
  0x47   : > { %v377_v37 = vsel %vm293_vm0, %v341_v32, 0.0  ;;  %v378_v38 = vsel %vm293_vm0, %v363_v33, 0.0 }
  0x48   : > { %v371_v39 = vrot.slane %v370_v36, 4  ;;  %v379_v40 = vadd.f32 %v378_v38, %v377_v37 }
  0x4a   : > { %v372_v46 = vadd.f32 %v371_v39, %v370_v36  ;;  %v380_v47 = vrot.slane %v379_v40, 4 }
  0x4b   : > { %v519_v41 = vpop.eup %518 }
  0x4c   : > { %v521_v43 = vpop.eup %520  ;;  %v230_v44 = vmul.f32 %v519_v41, %v227_v23  ;;  %v373_v50 = vrot.slane %v372_v46, 2  ;;  %v381_v51 = vadd.f32 %v380_v47, %v379_v40 }
  0x4d   : > { %v237_v48 = vmul.f32 %v521_v43, %v228_v24 }
  0x4e   : > { %v232_v49 = vsel %vm231_vm1, %v227_v23, %v230_v44  ;;  %v374_v56 = vadd.f32 %v373_v50, %v372_v46  ;;  %v382_v57 = vrot.slane %v381_v51, 2 }
  0x4f   : > { %v235_v52 = vsel %vm233_vm2, %v234_v42, %v232_v49  ;;  %v239_v53 = vsel %vm238_vm3, %v228_v24, %v237_v48 }
  0x50   : > { %v242_v54 = vsel %vm240_vm4, %v241_v45, %v239_v53  ;;  %v251_v55 = vrot.slane %v235_v52, %v250_v25  ;;  %v375_v61 = vrot.slane %v374_v56, 1  ;;  %v383_v62 = vadd.f32 %v382_v57, %v381_v51 }
  0x51   : > { %v273_v58 = vrot.slane %v242_v54, %v250_v25 }
  0x52   : > { %v252_v59 = vcombine.high %v251_v55, %v251_v55  ;;  %v259_v60 = vrot.slane %v251_v55, %v250_v25  ;;  %v376_v3 = vadd.f32 %v375_v61, %v374_v56  ;;  %v384_v4 = vrot.slane %v383_v62, 1 }
  0x53   : > { %v274_v63 = vcombine.high %v273_v58, %v273_v58  ;;  %v281_v0 = vrot.slane %v273_v58, %v250_v25 }
  0x54   : > { %v266_v1 = vrot.slane %v252_v59, %v250_v25  ;;  %v294_v2 = vsel %vm293_vm0, %v259_v60, 0.0  ;;  %v385_v9 = vadd.f32 %v384_v4, %v383_v62 }
  0x55   : > { %v288_v5 = vrot.slane %v274_v63, %v250_v25  ;;  %v295_v6 = vsel %vm293_vm0, %v281_v0, 0.0 }
  0x56   : > { %v296_v7 = vadd.f32 %v295_v6, %v294_v2  ;;  %v303_v8 = vsel %vm293_vm0, %v266_v1, 0.0  ;;  %v388_v13 = vsel %vm314_vm5, %v385_v9, %v376_v3 }
  0x57   : > { %v304_v10 = vsel %vm293_vm0, %v288_v5, 0.0  ;;  %478 = vst [vmem:[%s210_s14 + $0x2] sm:$0x3] %v388_v13 }
  0x58   : > { %v297_v11 = vrot.slane %v296_v7, 4  ;;  %v305_v12 = vadd.f32 %v304_v10, %v303_v8 }
  0x5a   : > { %v298_v14 = vadd.f32 %v297_v11, %v296_v7  ;;  %v306_v15 = vrot.slane %v305_v12, 4 }
  0x5c   : > { %v299_v16 = vrot.slane %v298_v14, 2  ;;  %v307_v17 = vadd.f32 %v306_v15, %v305_v12 }
  0x5e   : > { %v300_v18 = vadd.f32 %v299_v16, %v298_v14  ;;  %v308_v19 = vrot.slane %v307_v17, 2 }
  0x60   : > { %v301_v20 = vrot.slane %v300_v18, 1  ;;  %v309_v21 = vadd.f32 %v308_v19, %v307_v17 }
  0x62   : > { %v302_v22 = vadd.f32 %v301_v20, %v300_v18  ;;  %v310_v23 = vrot.slane %v309_v21, 1 }
  0x64   : > { %v311_v24 = vadd.f32 %v310_v23, %v309_v21 }
  0x66   : > { %v315_v25 = vsel %vm314_vm5, %v311_v24, %v302_v22 }
  0x67   : > { %317 = vst [vmem:[%s210_s14] sm:$0x3] %v315_v25 }
  0x68 PF: > { %p10_p6 = scmp.ge.s32.totalorder %s601_s13, 4   ;;  %s677_s9 = smov %s559_s10 }
  0x69   : > { %s678_s10 = smov %s611_s16  ;;  %s679_s11 = smov %s601_s13 }
  0x6a   :  { %12 = sbr.rel (!%p10_p6) target bundleno = 2 (0x2), region = 110 }
  0x71   :  { %413 = vsyncpa [#allocation3], 1 }
  0x72   :  { %415 = vsyncpa [#allocation3 + $0x1], 1 }

// kernel: group_norm_2d.5
= control target key start
LH: loop header
LB: loop body
LE: loop exit
PB: predicated region body
PF: predicated region fallthrough
CT: control target
= control target key end

     0   :  { %s594_s0 = inlined_call_operand.vmem [shape: f32[2], index: 0, kind: input, shape index: {}]   ;;  %s595_s1 = inlined_call_operand.<no memory space> [shape: f32[1], index: 1, kind: input, shape index: {}]   ;;  %s596_s2 = inlined_call_operand.vmem [shape: f32[2,2,4,256], index: 2, kind: input, shape index: {}]   ;;  %s597_s3 = inlined_call_operand.vmem [shape: f32[2,2,4,256], index: 3, kind: output, shape index: {}]  }
   0x1   :  { %8 = sst [smem:[#allocation2]] %s595_s1 }
   0x2   :  { %9 = vsyncpa [#allocation4], 0  ;;  %s510_s14 = smov 0   ;;  %s512_s15 = smov 0  }
   0x3   :  { %s514_s16 = smov 0  }
   0x4 LB: > { %s526_s1 = sadd.s32 4294967295, %s484_s16   ;;  %s529_s17 = sadd.s32 1, %s484_s16   ;;  %s484_s16 = sphi %s514_s16, %s604_s16   ;;  %s480_s15 = sphi %s512_s15, %s603_s15   ;;  %s476_s14 = sphi %s510_s14, %s602_s14  }
   0x5   : > { %s61_s18 = ssub.s32 %s484_s16, %s529_s17  ;;  %s64_s19 = sadd.s32 1, %s480_s15 }
   0x6   : > { %p62_p0 = scmp.eq.s32.totalorder %s61_s18, 0  ;;  %p71_p1 = scmp.ne.s32.totalorder %s480_s15, %s476_s14 }
   0x7   : > { %p72_p2 = scmp.eq.s32.totalorder %s484_s16, 0  ;;  %p101_p3 = scmp.eq.s32.totalorder %s526_s1, 1 }
   0x8   : > { %s539_s20 = scalar_select %p62_p0, %s480_s15, %s64_s19  }
   0x9   : > { %p541_p4 = por %p72_p2, %p71_p1  ;;  %p545_p5 = por %p101_p3, %p71_p1 }
   0xa   : > { %p390_p6 = scmp.ge.s32.totalorder %s484_s16, 1  ;;  %p114_p7 = scmp.lt.s32.totalorder %s484_s16, 3 }
   0xb   : > { %s599_s22 = scalar_select %p545_p5, 1, 0 }
   0xc   : > { %p416_p8 = scmp.eq.s32.totalorder %s526_s1, 0  ;;  %p552_p9 = pnand %p390_p6, %p114_p7 }
   0xd   : > { %s127_s26 = sshll.u32 %s594_s0, 4  ;;  %s128_s26 = int_to_ptr.vmem [resolvable:$true] %s127_s26 }
   0xe   : > { %p412_p10 = pneg %p552_p9  ;;  %s443_s27 = scalar_lea.vmem %s128_s26, 16 }
   0xf   : > { %p444_p12 = scmp.ne.s32.totalorder %s128_s26, %s443_s27  ;;  %p451_p2 = scmp.lt.s32.totalorder %s128_s26, %s128_s26 }
  0x10   : > { %p413_p11 = pnand %p416_p8, %p412_p10  ;;  %p452_p3 = scmp.lt.s32.totalorder %s443_s27, %s443_s27 }
  0x12   : > { %p445_p13 = pneg %p413_p11  ;;  %p453_p6 = por %p452_p3, %p451_p2 }
  0x14   : > { %p446_p0 = pnand %p445_p13, %p444_p12 }
  0x16   : > { %p447_p1 = pneg %p446_p0 }
  0x18   : > { %p454_p7 = pnand %p453_p6, %p447_p1 }
  0x1a   : > { %457 = shalt.err (!%p454_p7)
}
  0x1b   : > { %s486_s28 = smov [#allocation3]   ;;  %p392_p5 = scmp.ge.s32.totalorder %s484_s16, 2 }
  0x1c   : > { %415 = dma.vmem_to_smem (!%p413_p11), %s128_s26, 16, %s486_s28, [#allocation4]  }
  0x1d   : > { %137 = sbr.rel (%p392_p5) target bundleno = 43 (0x2b), region = 24 }
  0x24   : > { %140 = sbr.rel (!%p541_p4) target bundleno = 43 (0x2b), region = 28  ;;  %s142_s29 = sand.u32 (%p541_p4), 1, %s480_s15  }
  0x25   : > { %s394_s30 = sshll.u32 (%p541_p4), %s484_s16, 2  ;;  %s393_s4 = sshll.u32 (%p541_p4), %s142_s29, 4 }
  0x26   : > { %s146_s7 = scalar_lea.vmem (%p541_p4), %s596_s2, %s394_s30  ;;  %s144_s8 = scalar_lea.vmem (%p541_p4), [#allocation5], %s393_s4 }
  0x27   : > { %v162_v0 = vld [vmem:[%s146_s7] sm:$0xf] (%p541_p4)  ;;  %v164_v1 = vld [vmem:[%s146_s7 + $0x8] sm:$0xf] (%p541_p4)  ;;  %v166_v2 = vld [vmem:[%s146_s7 + $0x10] sm:$0xf] (%p541_p4) }
  0x28   : > { %163 = vst [vmem:[%s144_s8] sm:$0xf] (%p541_p4), %v162_v0  ;;  %165 = vst [vmem:[%s144_s8 + $0x4] sm:$0xf] (%p541_p4), %v164_v1  ;;  %v168_v3 = vld [vmem:[%s146_s7 + $0x18] sm:$0xf] (%p541_p4) }
  0x29   : > { %167 = vst [vmem:[%s144_s8 + $0x8] sm:$0xf] (%p541_p4), %v166_v2  ;;  %169 = vst [vmem:[%s144_s8 + $0xc] sm:$0xf] (%p541_p4), %v168_v3 }
  0x2b PF: > { %203 = sbr.rel (%p552_p9) target bundleno = 78 (0x4e), region = 69 }
  0x32   : > { %471 = dma.done.wait (%p416_p8), [#allocation4], 16  }
  0x33   : > { %473 = vsyncadd (%p416_p8), [#allocation4], 4294967280  ;;  %s210_s9 = sand.u32 1, %s476_s14  }
  0x34   : > { %s397_s10 = sshll.u32 %s210_s9, 4 }
  0x35   : > { %s212_s11 = scalar_lea.vmem [#allocation5], %s397_s10 }
  0x36   : > { %216 = sfence }
  0x37   : > { %s233_s12 = sld [smem:[#allocation3]]  ;;  %s399_s16 = sld [smem:[#allocation3 + $0x1]]  ;;  %v235_v4 = vld [vmem:[%s212_s11] sm:$0x3]  ;;  %v236_v5 = vld [vmem:[%s212_s11 + $0x4] sm:$0x3] }
  0x38   : > { %s245_s13 = sld [smem:[#allocation2]]  ;;  %v237_v6 = vld [vmem:[%s212_s11 + $0x8] sm:$0x3]  ;;  %v238_v7 = vld [vmem:[%s212_s11 + $0xc] sm:$0x3]  ;;  %s232_s14 = scalar_lea.vmem [#allocation6], %s397_s10 }
  0x39   : > { %p601_p4 = scmp.ne.s32.totalorder %s599_s22, 0 }
  0x3a   : > { %s405_s18 = sshll.u32 (%p601_p4), %s526_s1, 2 }
  0x3b   : > { %s268_s23 = scalar_lea.vmem (%p601_p4), %s597_s3, %s405_s18 }
  0x3d   : > { %v239_v8 = vstv %s233_s12  ;;  %v242_v12 = vstv %s399_s16 }
  0x3e   : > { %v240_v9 = vsub.f32 %v235_v4, %v239_v8  ;;  %v246_v10 = vstv %s245_s13  ;;  %v241_v11 = vsub.f32 %v236_v5, %v239_v8  ;;  %v243_v13 = vsub.f32 %v237_v6, %v242_v12 }
  0x3f   : > { %v244_v14 = vsub.f32 %v238_v7, %v242_v12  ;;  %266 = sbr.rel (!%p601_p4) target bundleno = 78 (0x4e), region = 81 }
  0x40   : > { %v247_v15 = vmul.f32 %v246_v10, %v240_v9  ;;  %v248_v16 = vmul.f32 %v246_v10, %v241_v11  ;;  %v249_v17 = vmul.f32 %v246_v10, %v243_v13 }
  0x41   : > { %v250_v18 = vmul.f32 %v246_v10, %v244_v14 }
  0x42   : > { %251 = vst [vmem:[%s232_s14] sm:$0x3] %v247_v15  ;;  %256 = vst [vmem:[%s232_s14 + $0x2] sm:$0x3] %v247_v15 }
  0x43   : > { %252 = vst [vmem:[%s232_s14 + $0x4] sm:$0x3] %v248_v16  ;;  %257 = vst [vmem:[%s232_s14 + $0x6] sm:$0x3] %v248_v16 }
  0x44   : > { %400 = vst [vmem:[%s232_s14 + $0x8] sm:$0x3] %v249_v17  ;;  %402 = vst [vmem:[%s232_s14 + $0xa] sm:$0x3] %v249_v17 }
  0x45   : > { %401 = vst [vmem:[%s232_s14 + $0xc] sm:$0x3] %v250_v18  ;;  %403 = vst [vmem:[%s232_s14 + $0xe] sm:$0x3] %v250_v18 }
  0x49   : > { %v284_v19 = vld [vmem:[%s232_s14] sm:$0xf] }
  0x4a   : > { %v286_v20 = vld [vmem:[%s232_s14 + $0x4] sm:$0xf]  ;;  %285 = vst [vmem:[%s268_s23] sm:$0xf] %v284_v19 }
  0x4b   : > { %v288_v21 = vld [vmem:[%s232_s14 + $0x8] sm:$0xf]  ;;  %287 = vst [vmem:[%s268_s23 + $0x8] sm:$0xf] %v286_v20 }
  0x4c   : > { %v290_v22 = vld [vmem:[%s232_s14 + $0xc] sm:$0xf]  ;;  %289 = vst [vmem:[%s268_s23 + $0x10] sm:$0xf] %v288_v21 }
  0x4d   : > { %291 = vst [vmem:[%s268_s23 + $0x18] sm:$0xf] %v290_v22 }
  0x4e PF: > { %p12_p5 = scmp.ge.s32.totalorder %s529_s17, 4   ;;  %s602_s14 = smov %s480_s15 }
  0x4f   : > { %s603_s15 = smov %s539_s20  ;;  %s604_s16 = smov %s529_s17 }
  0x50   :  { %14 = sbr.rel (!%p12_p5) target bundleno = 4 (0x4), region = 155 }
  0x57   :  { %332 = vsyncpa [#allocation4], 1 }
  0x58   :  { %334 = vsyncpa [#allocation4 + $0x1], 1 }

</bundles_post_ra>
